<compile_context>
chip_gen: v5e
topology: v5e:2x2
jax: 0.10.0
libtpu: 0.0.40
codegen_flags: <defaults>
</compile_context>

<pallas_src>
import math

import jax
import jax.numpy as jnp
from jax.experimental import pallas as pl
from jax.experimental.pallas import tpu as pltpu

_LANES = 128


def _round_up(n: int, m: int) -> int:
    return ((n + m - 1) // m) * m


def _mlp_light_kernel(x_ref, wbd_ref, bbd_ref, wca_ref, bca_ref,
                      wout_ref, bout_ref, o_ref):
    # x arrives as f32 straight from HBM (no extra wrapper pass); the bf16
    # cast is a cheap VPU pass hidden under the input DMA.
    x = x_ref[...].astype(jnp.bfloat16)

    # ---- layer 1: per-channel Linear(n_samples -> n_ta) + flatten + ReLU ----
    # Expressed as one 2-D matmul with a block-diagonal weight (C copies of
    # w_ta^T on the diagonal), zero-padded along the output dim to 128 lanes.
    # TODO(synk): for n_channels >~ 16 the block-diagonal weight grows O(C^2);
    # switch layer 1 to a dense (S, n_ta) matmul on a (TB*C, S) view instead.
    h1 = jnp.dot(x, wbd_ref[...], preferred_element_type=jnp.float32)
    h1 = jnp.maximum(h1 + bbd_ref[...], 0.0)

    # ---- layer 2: Linear(C*n_ta -> n_ca) + ReLU (n_ca padded to 128) --------
    h2 = jnp.dot(h1.astype(jnp.bfloat16), wca_ref[...],
                 preferred_element_type=jnp.float32)
    h2 = jnp.maximum(h2 + bca_ref[...], 0.0)

    # ---- layer 3: Linear(n_ca -> n_out) (both dims padded to 128) -----------
    out = jnp.dot(h2.astype(jnp.bfloat16), wout_ref[...],
                  preferred_element_type=jnp.float32)
    # Full-lane, unmasked store of the padded block.
    o_ref[...] = (out + bout_ref[...]).astype(o_ref.dtype)


def mlp_light_forward(x, params, n_out, *, tb_target=4096,
                      vmem_budget_bytes=20 << 20):
    """MUAPTClassifierMLPLight forward via a Pallas TPU kernel.

    x      : (B, C, S) float32
    params : dict from init_params (bf16 weights, f32 biases, pre-padded)
    n_out  : number of (unpadded) output classes
    """
    wbd, bbd = params["wbd"], params["bbd"]
    wca, bca = params["wca"], params["bca"]
    wout, bout = params["wout"], params["bout"]

    B, C, S = x.shape
    F = C * S
    H1 = wbd.shape[1]      # C*n_ta padded to a multiple of 128
    NO = wout.shape[1]     # n_out padded to a multiple of 128

    # Row-major contiguous reshape: free, stays f32 (no extra HBM pass).
    x2 = x.reshape(B, F)

    # ---- batch tile from a VMEM budget --------------------------------------
    # Per-row VMEM bytes resident at a time:
    #   2 x F f32 input buffers (double-buffered)
    # + 2 x NO bf16 output buffers (double-buffered)
    # + temporaries: x bf16 (F*2), h1 f32+bf16 (H1*6), h2/out f32+bf16 (NO*10)
    per_row = 2 * F * 4 + 2 * NO * 2 + F * 2 + H1 * 6 + NO * 10
    tb_budget = max(16, vmem_budget_bytes // max(per_row, 1))
    TB = min(tb_target, tb_budget, _round_up(B, 16))
    TB = max(16, (TB // 16) * 16)              # multiple of 16 (sublane packing)
    # Guarantee >= 2 tiles whenever the batch is big enough to split, so the
    # "parallel" axis actually shards across v7x's two TensorCores and the x
    # prefetch pipeline has something to overlap.
    if B >= 32 and pl.cdiv(B, TB) < 2:
        TB = _round_up(pl.cdiv(B, 2), 16)
    grid = (pl.cdiv(B, TB),)

    def full(a):
        # Grid-invariant (weight / bias) block: whole array, fixed block index.
        # (Kept double-buffered by default; their footprint is tiny at small C.)
        return pl.BlockSpec(a.shape, lambda i, _nd=a.ndim: (0,) * _nd)

    out = pl.pallas_call(
        _mlp_light_kernel,
        out_shape=jax.ShapeDtypeStruct((B, NO), jnp.bfloat16),
        grid_spec=pltpu.PrefetchScalarGridSpec(
            num_scalar_prefetch=0,
            grid=grid,
            in_specs=[
                pl.BlockSpec((TB, F), lambda i: (i, 0)),   # x: tiled over batch
                full(wbd), full(bbd),
                full(wca), full(bca),
                full(wout), full(bout),
            ],
            out_specs=pl.BlockSpec((TB, NO), lambda i: (i, 0)),
        ),
        compiler_params=pltpu.CompilerParams(
            # batch axis is embarrassingly parallel -> shard across v7x's two
            # TensorCores; harmless on single-TC v5e/v6e.
            dimension_semantics=("parallel",),
            vmem_limit_bytes=32 * 1024 * 1024,
        ),
    )(x2, wbd, bbd, wca, bca, wout, bout)

    # Slice off padded lanes and return f32 to callers.
    return out[:, :n_out].astype(jnp.float32)


def init_params(key, n_channels, n_samples, n_ta, n_ca, n_out):
    """Deterministic init matching nn.Linear's U(-1/sqrt(fan_in), 1/sqrt(fan_in)).

    Returns (kernel_params, raw_pytorch_layout_weights).
    """
    def linear(key, fan_in, fan_out):
        kw, kb = jax.random.split(key)
        bound = 1.0 / math.sqrt(fan_in)
        w = jax.random.uniform(kw, (fan_out, fan_in), jnp.float32, -bound, bound)
        b = jax.random.uniform(kb, (fan_out,), jnp.float32, -bound, bound)
        return w, b

    k_ta, k_ca, k_out = jax.random.split(key, 3)
    w_ta, b_ta = linear(k_ta, n_samples, n_ta)            # (n_ta, S)
    w_ca, b_ca = linear(k_ca, n_channels * n_ta, n_ca)    # (n_ca, C*n_ta)
    w_out, b_out = linear(k_out, n_ca, n_out)             # (n_out, n_ca)

    H1 = n_channels * n_ta
    H1_pad = _round_up(H1, _LANES)
    n_ca_pad = _round_up(n_ca, _LANES)
    n_out_pad = _round_up(n_out, _LANES)

    # Block-diagonal temporal-aggregation weight (C copies of w_ta^T on the
    # diagonal), zero-padded along the output dim -> layer 1 + PyTorch's
    # flatten(start_dim=1) become one clean 2-D matmul.
    wbd = jnp.kron(jnp.eye(n_channels, dtype=jnp.float32), w_ta.T)  # (C*S, H1)
    wbd = jnp.zeros((n_channels * n_samples, H1_pad), jnp.float32).at[:, :H1].set(wbd)
    bbd = jnp.zeros((1, H1_pad), jnp.float32).at[:, :H1].set(
        jnp.tile(b_ta, n_channels))

    # Channel aggregation, lane-padded to (H1_pad, 128) — padded rows/cols zero.
    wca_k = jnp.zeros((H1_pad, n_ca_pad), jnp.float32).at[:H1, :n_ca].set(w_ca.T)
    bca_k = jnp.zeros((1, n_ca_pad), jnp.float32).at[:, :n_ca].set(b_ca)

    # Output layer, lane-padded to (128, 128).
    wout_k = jnp.zeros((n_ca_pad, n_out_pad), jnp.float32).at[:n_ca, :n_out].set(w_out.T)
    bout_k = jnp.zeros((1, n_out_pad), jnp.float32).at[:, :n_out].set(b_out)

    params = {
        "wbd": wbd.astype(jnp.bfloat16),
        "bbd": bbd,                                        # f32 biases
        "wca": wca_k.astype(jnp.bfloat16),
        "bca": bca_k,
        "wout": wout_k.astype(jnp.bfloat16),
        "bout": bout_k,
    }
    raw = (w_ta, b_ta, w_ca, b_ca, w_out, b_out)
    return params, raw


def _reference(x, raw):
    """Pure-JAX f32 reference mirroring the PyTorch forward exactly."""
    w_ta, b_ta, w_ca, b_ca, w_out, b_out = raw
    h = jnp.maximum(jnp.einsum("bcs,ts->bct", x, w_ta) + b_ta, 0.0)
    h = h.reshape(h.shape[0], -1)
    h = jnp.maximum(h @ w_ca.T + b_ca, 0.0)
    return h @ w_out.T + b_out


if __name__ == "__main__":
    # Small shapes consistent with the module: in_shape=(n_channels, n_samples)
    B, C, S = 2, 4, 16
    n_ta, n_ca, n_out = 32, 32, 3

    key = jax.random.PRNGKey(0)
    k_x, k_p, k_x2 = jax.random.split(key, 3)
    x = jax.random.normal(k_x, (B, C, S), jnp.float32)
    params, raw = init_params(k_p, C, S, n_ta, n_ca, n_out)

    out = jax.block_until_ready(mlp_light_forward(x, params, n_out))
    ref = _reference(x, raw)
    assert out.shape == (B, n_out)
    # bf16 weights / bf16 padded output with f32 accumulation -> ~1% tolerance
    assert jnp.allclose(out, ref, atol=3e-2, rtol=3e-2), (out, ref)

    # Also exercise the multi-tile grid + partial tail block path.
    B2 = 300
    x_big = jax.random.normal(k_x2, (B2, C, S), jnp.float32)
    out2 = jax.block_until_ready(
        mlp_light_forward(x_big, params, n_out, tb_target=128))
    ref2 = _reference(x_big, raw)
    assert out2.shape == (B2, n_out)
    assert jnp.allclose(out2, ref2, atol=3e-2, rtol=3e-2)

    print("KERNEL_OK")
</pallas_src>

<mosaic_0001>
module attributes {stable_mosaic.version = 11 : i64} {
  func.func @_mlp_light_kernel(%arg0: i32, %arg1: memref<16x64xf32, #tpu.memory_space<vmem>>, %arg2: memref<64x128xbf16, #tpu.memory_space<vmem>>, %arg3: memref<1x128xf32, #tpu.memory_space<vmem>>, %arg4: memref<128x128xbf16, #tpu.memory_space<vmem>>, %arg5: memref<1x128xf32, #tpu.memory_space<vmem>>, %arg6: memref<128x128xbf16, #tpu.memory_space<vmem>>, %arg7: memref<1x128xf32, #tpu.memory_space<vmem>>, %arg8: memref<16x128xbf16, #tpu.memory_space<vmem>>) attributes {dimension_semantics = [#tpu.dimension_semantics<parallel>], iteration_bounds = array<i64: 1>, scalar_prefetch = 0 : i64, scratch_operands = 0 : i64, tpu.core_type = #tpu.core_type<tc>, window_params = [{transform_indices = @transform_0, window_bounds = array<i64: 16, 64>}, {pipeline_mode = #tpu.pipeline_mode<synchronous>, transform_indices = @transform_1, window_bounds = array<i64: 64, 128>}, {pipeline_mode = #tpu.pipeline_mode<synchronous>, transform_indices = @transform_2, window_bounds = array<i64: 1, 128>}, {pipeline_mode = #tpu.pipeline_mode<synchronous>, transform_indices = @transform_3, window_bounds = array<i64: 128, 128>}, {pipeline_mode = #tpu.pipeline_mode<synchronous>, transform_indices = @transform_4, window_bounds = array<i64: 1, 128>}, {pipeline_mode = #tpu.pipeline_mode<synchronous>, transform_indices = @transform_5, window_bounds = array<i64: 128, 128>}, {pipeline_mode = #tpu.pipeline_mode<synchronous>, transform_indices = @transform_6, window_bounds = array<i64: 1, 128>}, {transform_indices = @transform_7, window_bounds = array<i64: 16, 128>}]} {
    %c0 = arith.constant 0 : index
    %c0_0 = arith.constant 0 : index
    %0 = vector.load %arg1[%c0, %c0_0] : memref<16x64xf32, #tpu.memory_space<vmem>>, vector<16x64xf32>
    %1 = arith.truncf %0 : vector<16x64xf32> to vector<16x64xbf16>
    %c0_1 = arith.constant 0 : index
    %c0_2 = arith.constant 0 : index
    %2 = vector.load %arg2[%c0_1, %c0_2] : memref<64x128xbf16, #tpu.memory_space<vmem>>, vector<64x128xbf16>
    %cst = arith.constant dense<0.000000e+00> : vector<16x128xf32>
    %3 = tpu.matmul %1, %2, %cst {dimension_numbers = #tpu.dot_dimension_numbers<[1], [0], [0], [1], [0, 0, 1, 1], [], []>} : vector<16x64xbf16>, vector<64x128xbf16>, vector<16x128xf32> -> vector<16x128xf32>
    %c0_3 = arith.constant 0 : index
    %c0_4 = arith.constant 0 : index
    %4 = vector.load %arg3[%c0_3, %c0_4] : memref<1x128xf32, #tpu.memory_space<vmem>>, vector<1x128xf32>
    %5 = vector.broadcast %4 : vector<1x128xf32> to vector<16x128xf32>
    %6 = arith.addf %3, %5 : vector<16x128xf32>
    %cst_5 = arith.constant 0.000000e+00 : f32
    %7 = vector.broadcast %cst_5 : f32 to vector<16x128xf32>
    %8 = arith.maximumf %6, %7 : vector<16x128xf32>
    %9 = arith.truncf %8 : vector<16x128xf32> to vector<16x128xbf16>
    %c0_6 = arith.constant 0 : index
    %c0_7 = arith.constant 0 : index
    %10 = vector.load %arg4[%c0_6, %c0_7] : memref<128x128xbf16, #tpu.memory_space<vmem>>, vector<128x128xbf16>
    %cst_8 = arith.constant dense<0.000000e+00> : vector<16x128xf32>
    %11 = tpu.matmul %9, %10, %cst_8 {dimension_numbers = #tpu.dot_dimension_numbers<[1], [0], [0], [1], [0, 0, 1, 1], [], []>} : vector<16x128xbf16>, vector<128x128xbf16>, vector<16x128xf32> -> vector<16x128xf32>
    %c0_9 = arith.constant 0 : index
    %c0_10 = arith.constant 0 : index
    %12 = vector.load %arg5[%c0_9, %c0_10] : memref<1x128xf32, #tpu.memory_space<vmem>>, vector<1x128xf32>
    %13 = vector.broadcast %12 : vector<1x128xf32> to vector<16x128xf32>
    %14 = arith.addf %11, %13 : vector<16x128xf32>
    %cst_11 = arith.constant 0.000000e+00 : f32
    %15 = vector.broadcast %cst_11 : f32 to vector<16x128xf32>
    %16 = arith.maximumf %14, %15 : vector<16x128xf32>
    %17 = arith.truncf %16 : vector<16x128xf32> to vector<16x128xbf16>
    %c0_12 = arith.constant 0 : index
    %c0_13 = arith.constant 0 : index
    %18 = vector.load %arg6[%c0_12, %c0_13] : memref<128x128xbf16, #tpu.memory_space<vmem>>, vector<128x128xbf16>
    %cst_14 = arith.constant dense<0.000000e+00> : vector<16x128xf32>
    %19 = tpu.matmul %17, %18, %cst_14 {dimension_numbers = #tpu.dot_dimension_numbers<[1], [0], [0], [1], [0, 0, 1, 1], [], []>} : vector<16x128xbf16>, vector<128x128xbf16>, vector<16x128xf32> -> vector<16x128xf32>
    %c0_15 = arith.constant 0 : index
    %c0_16 = arith.constant 0 : index
    %20 = vector.load %arg7[%c0_15, %c0_16] : memref<1x128xf32, #tpu.memory_space<vmem>>, vector<1x128xf32>
    %21 = vector.broadcast %20 : vector<1x128xf32> to vector<16x128xf32>
    %22 = arith.addf %19, %21 : vector<16x128xf32>
    %23 = arith.truncf %22 : vector<16x128xf32> to vector<16x128xbf16>
    %c0_17 = arith.constant 0 : index
    %c0_18 = arith.constant 0 : index
    %24 = vector.load %arg8[%c0_17, %c0_18] : memref<16x128xbf16, #tpu.memory_space<vmem>>, vector<16x128xbf16>
    tpu.vector_store %arg8[%c0_17, %c0_18], %23 {strides = array<i32>} : memref<16x128xbf16, #tpu.memory_space<vmem>>, vector<16x128xbf16>,
    return
  }
  func.func @transform_0(%arg0: i32) -> (i32, i32) {
    %c0_i32 = arith.constant 0 : i32
    %c0_i32_0 = arith.constant 0 : i32
    return %arg0, %c0_i32 : i32, i32
  }
  func.func @transform_1(%arg0: i32) -> (i32, i32) {
    %c0_i32 = arith.constant 0 : i32
    %c0_i32_0 = arith.constant 0 : i32
    %c0_i32_1 = arith.constant 0 : i32
    return %c0_i32, %c0_i32_0 : i32, i32
  }
  func.func @transform_2(%arg0: i32) -> (i32, i32) {
    %c0_i32 = arith.constant 0 : i32
    %c0_i32_0 = arith.constant 0 : i32
    %c0_i32_1 = arith.constant 0 : i32
    return %c0_i32, %c0_i32_0 : i32, i32
  }
  func.func @transform_3(%arg0: i32) -> (i32, i32) {
    %c0_i32 = arith.constant 0 : i32
    %c0_i32_0 = arith.constant 0 : i32
    %c0_i32_1 = arith.constant 0 : i32
    return %c0_i32, %c0_i32_0 : i32, i32
  }
  func.func @transform_4(%arg0: i32) -> (i32, i32) {
    %c0_i32 = arith.constant 0 : i32
    %c0_i32_0 = arith.constant 0 : i32
    %c0_i32_1 = arith.constant 0 : i32
    return %c0_i32, %c0_i32_0 : i32, i32
  }
  func.func @transform_5(%arg0: i32) -> (i32, i32) {
    %c0_i32 = arith.constant 0 : i32
    %c0_i32_0 = arith.constant 0 : i32
    %c0_i32_1 = arith.constant 0 : i32
    return %c0_i32, %c0_i32_0 : i32, i32
  }
  func.func @transform_6(%arg0: i32) -> (i32, i32) {
    %c0_i32 = arith.constant 0 : i32
    %c0_i32_0 = arith.constant 0 : i32
    %c0_i32_1 = arith.constant 0 : i32
    return %c0_i32, %c0_i32_0 : i32, i32
  }
  func.func @transform_7(%arg0: i32) -> (i32, i32) {
    %c0_i32 = arith.constant 0 : i32
    %c0_i32_0 = arith.constant 0 : i32
    return %arg0, %c0_i32 : i32, i32
  }
}

</mosaic_0001>

<bundles_post_ra>
// kernel: tpu_custom_call.1
= control target key start
LH: loop header
LB: loop body
LE: loop exit
PB: predicated region body
PF: predicated region fallthrough
CT: control target
= control target key end

     0   :  { %12 = vsyncpa [#allocation3], 0  ;;  %s715_s0 = inlined_call_operand.hbm [shape: f32[2,64], index: 0, kind: input, shape index: {}]   ;;  %s716_s1 = inlined_call_operand.hbm [shape: bf16[64,128], index: 1, kind: input, shape index: {}]   ;;  %s717_s2 = inlined_call_operand.vmem [shape: f32[1,128], index: 2, kind: input, shape index: {}]   ;;  %s718_s3 = inlined_call_operand.hbm [shape: bf16[128,128], index: 3, kind: input, shape index: {}]   ;;  %s719_s4 = inlined_call_operand.vmem [shape: f32[1,128], index: 4, kind: input, shape index: {}]   ;;  %s720_s5 = inlined_call_operand.hbm [shape: bf16[128,128], index: 5, kind: input, shape index: {}]   ;;  %s721_s6 = inlined_call_operand.vmem [shape: f32[1,128], index: 6, kind: input, shape index: {}]   ;;  %s722_s7 = inlined_call_operand.hbm [shape: bf16[2,128], index: 7, kind: output, shape index: {}]  }
   0x1   :  { %13 = vsyncpa [#allocation6], 0 }
   0x2   :  { %14 = vsyncpa [#allocation9], 0 }
   0x3   :  { %15 = vsyncpa [#allocation4], 0  ;;  %s33_s26 = sshll.u32 %s716_s1, 4  ;;  %s34_s26 = int_to_ptr.hbm [resolvable:$true] %s33_s26 }
   0x4   :  { %19 = vsyncadd [#allocation3], 224  ;;  %s632_s27 = smov [#allocation5]   ;;  %s20_s8 = sshll.u32 %s715_s0, 4  ;;  %s21_s8 = int_to_ptr.hbm [resolvable:$true] %s20_s8 }
   0x5   :  { %s35_s28 = sshll.u32 %s632_s27, 4  ;;  %s633_s9 = smov 64   ;;  %s36_s28 = int_to_ptr.vmem [resolvable:$true] %s35_s28 }
   0x6   :  { %s634_s10 = smov 4   ;;  %s635_s11 = smov [#allocation2]  }
   0x7   :  { %41 = dma.hbm_to_vmem [thread:$0]  %s34_s26, 512, %s36_s28, [#allocation6], %s633_s9, %s633_s9, %s634_s10  }
   0x8   :  { %s22_s12 = sshll.u32 %s635_s11, 4  ;;  %s636_s13 = smov 32   ;;  %s23_s12 = int_to_ptr.vmem [resolvable:$true] %s22_s12 }
   0x9   :  { %s637_s14 = smov 2   ;;  %s48_s16 = sshll.u32 %s718_s3, 4  ;;  %s49_s16 = int_to_ptr.hbm [resolvable:$true] %s48_s16 }
   0xa   :  { %28 = dma.hbm_to_vmem [thread:$0]  %s21_s8, 32, %s23_s12, [#allocation3], %s636_s13, %s636_s13, %s637_s14  }
   0xb   :  { %s638_s17 = smov [#allocation7]   ;;  %s63_s20 = sshll.u32 %s720_s5, 4  ;;  %s64_s20 = int_to_ptr.hbm [resolvable:$true] %s63_s20 }
   0xc   :  { %s50_s18 = sshll.u32 %s638_s17, 4  ;;  %s639_s21 = smov [#allocation8]   ;;  %s51_s18 = int_to_ptr.vmem [resolvable:$true] %s50_s18 }
   0xd   :  { %56 = dma.hbm_to_vmem [thread:$0]  %s49_s16, 1024, %s51_s18, [#allocation6], %s633_s9, %s633_s9, %s634_s10  }
   0xe   :  { %s65_s22 = sshll.u32 %s639_s21, 4  ;;  %s66_s22 = int_to_ptr.vmem [resolvable:$true] %s65_s22 }
   0xf   :  { %71 = dma.hbm_to_vmem [thread:$0]  %s64_s20, 1024, %s66_s22, [#allocation9], %s633_s9, %s633_s9, %s634_s10  }
  0x10   :  { %624 = dma.done.wait [#allocation3], 256  }
  0x11   :  { %625 = vsyncadd [#allocation3], 4294967040 }
  0x12   :  { %626 = dma.done.wait [#allocation6], 1536  }
  0x13   :  { %627 = vsyncadd [#allocation6], 4294965760 }
  0x14   :  { %628 = dma.done.wait [#allocation9], 1024  }
  0x15   :  { %629 = vsyncadd [#allocation9], 4294966272  ;;  %v473_v0 = vld [vmem:[#allocation5 + $0x18] sm:$0xff]  ;;  %v472_v1 = vld [vmem:[#allocation5 + $0x10] sm:$0xff]  ;;  %vm130_vm0 = vcmask 523264   ;;  %vm324_vm1 = vcmask 1040384  }
  0x16   :  { %138 = vmatpush.bf16.msra.mxu0 %v473_v0  ;;  %v481_v2 = vld [vmem:[#allocation7 + $0x38] sm:$0xff]  ;;  %v480_v3 = vld [vmem:[#allocation7 + $0x30] sm:$0xff]  ;;  %v471_v4 = vld [vmem:[#allocation5 + $0x8] sm:$0xff]  ;;  %vm328_vm2 = vcmask 1041409   ;;  %vm332_vm3 = vcmask 1042434   ;;  %vm336_vm4 = vcmask 1043459  }
  0x17   :  { %219 = vmatpush.bf16.msra.mxu1 %v481_v2  ;;  %v479_v5 = vld [vmem:[#allocation7 + $0x28] sm:$0xff]  ;;  %v470_v6 = vld [vmem:[#allocation5] sm:$0xff]  ;;  %v91_v7 = vld [vmem:[#allocation2] sm:$0xff] }
  0x18   :  { %v92_v8 = vld [vmem:[#allocation2 + $0x8] sm:$0xff]  ;;  %v478_v9 = vld [vmem:[#allocation7 + $0x20] sm:$0xff]  ;;  %v476_v12 = vld [vmem:[#allocation7 + $0x10] sm:$0xff] }
  0x19   :  { %v93_v10 = vpack.c.bf16 %v92_v8, %v91_v7  ;;  %v477_v11 = vld [vmem:[#allocation7 + $0x18] sm:$0xff]  ;;  %v475_v13 = vld [vmem:[#allocation7 + $0x8] sm:$0xff]  ;;  %v474_v14 = vld [vmem:[#allocation7] sm:$0xff] }
  0x1a   :  { %139 = vmatpush.bf16.msra.mxu0 %v472_v1  ;;  %v489_v15 = vld [vmem:[#allocation8 + $0x38] sm:$0xff]  ;;  %v488_v16 = vld [vmem:[#allocation8 + $0x30] sm:$0xff]  ;;  %v487_v17 = vld [vmem:[#allocation8 + $0x28] sm:$0xff] }
  0x1b   :  { %220 = vmatpush.bf16.msra.mxu1 %v480_v3  ;;  %304 = vmatpush.bf16.msra.mxu2 %v489_v15  ;;  %v486_v18 = vld [vmem:[#allocation8 + $0x20] sm:$0xff]  ;;  %v501_v20 = vld [vmem:[%s717_s2] ss:$0 sm:$0xff]  ;;  %v485_v27 = vld [vmem:[#allocation8 + $0x18] sm:$0xff] }
  0x1c   :  { %v484_v28 = vld [vmem:[#allocation8 + $0x10] sm:$0xff]  ;;  %v483_v29 = vld [vmem:[#allocation8 + $0x8] sm:$0xff]  ;;  %v482_v30 = vld [vmem:[#allocation8] sm:$0xff] }
  0x1d   :  { %v502_v32 = vld [vmem:[%s719_s4] ss:$0 sm:$0xff] }
  0x1e   :  { %140 = vmatpush.bf16.msra.mxu0 %v471_v4  ;;  %v503_v39 = vld [vmem:[%s721_s6] ss:$0 sm:$0xff] }
  0x1f   :  { %221 = vmatpush.bf16.msra.mxu1 %v479_v5  ;;  %305 = vmatpush.bf16.msra.mxu2 %v488_v16 }
  0x22   :  { %141 = vmatpush.bf16.msra.mxu0 %v470_v6 }
  0x23   :  { %222 = vmatpush.bf16.msra.mxu1 %v478_v9  ;;  %306 = vmatpush.bf16.msra.mxu2 %v487_v17 }
  0x25   :  { %405 = vmatmul.msk.bf16.vlgmr.msra.gmra.mxu0 %vm130_vm0, %v93_v10 }
  0x27   :  { %223 = vmatpush.bf16.msra.mxu1 %v477_v11  ;;  %307 = vmatpush.bf16.msra.mxu2 %v486_v18 }
  0x2b   :  { %224 = vmatpush.bf16.msra.mxu1 %v476_v12  ;;  %308 = vmatpush.bf16.msra.mxu2 %v485_v27 }
  0x2f   :  { %225 = vmatpush.bf16.msra.mxu1 %v475_v13  ;;  %309 = vmatpush.bf16.msra.mxu2 %v484_v28 }
  0x33   :  { %226 = vmatpush.bf16.msra.mxu1 %v474_v14  ;;  %310 = vmatpush.bf16.msra.mxu2 %v483_v29 }
  0x37   :  { %311 = vmatpush.bf16.msra.mxu2 %v482_v30 }
  0xa2   :  { %v143_v19 = vpop.f32.mrf.mxu0 }
  0xa3   :  { %v144_v21 = vadd.f32 %v501_v20, %v143_v19 }
  0xa5   :  { %v148_v24 = vmax.f32 %v144_v21, 0.0 }
  0xaa   :  { %v145_v22 = vpop.f32.mrf.mxu0 }
  0xab   :  { %v146_v23 = vadd.f32 %v501_v20, %v145_v22 }
  0xad   :  { %v149_v25 = vmax.f32 %v146_v23, 0.0 }
  0xaf   :  { %v150_v26 = vpack.c.bf16 %v149_v25, %v148_v24 }
  0xb1   :  { %227 = vmatmul.bf16.vlgmr.msra.gmra.mxu1 %v150_v26 }
 0x12e   :  { %v228_v31 = vpop.f32.mrf.mxu1 }
 0x12f   :  { %v229_v33 = vadd.f32 %v502_v32, %v228_v31 }
 0x131   :  { %v233_v36 = vmax.f32 %v229_v33, 0.0 }
 0x136   :  { %v230_v34 = vpop.f32.mrf.mxu1 }
 0x137   :  { %v231_v35 = vadd.f32 %v502_v32, %v230_v34 }
 0x139   :  { %v234_v37 = vmax.f32 %v231_v35, 0.0 }
 0x13b   :  { %v235_v38 = vpack.c.bf16 %v234_v37, %v233_v36 }
 0x13d   :  { %312 = vmatmul.bf16.vlgmr.msra.gmra.mxu2 %v235_v38 }
 0x1c0   :  { %v313_v40 = vpop.f32.mrf.mxu2 }
 0x1c1   :  { %v314_v41 = vadd.f32 %v503_v39, %v313_v40 }
 0x1c3   :  { %v318_v42 = vpack.c.bf16 %v314_v41, %v314_v41 }
 0x1c5   :  { %v322_v43 = vrot.slane %v318_v42, 3 }
 0x1c7   :  { %v327_v44 = vsel %vm324_vm1, %v318_v42, %v322_v43  ;;  %v329_v45 = vsel %vm328_vm2, %v318_v42, %v322_v43  ;;  %v333_v46 = vsel %vm332_vm3, %v318_v42, %v322_v43  ;;  %v337_v47 = vsel %vm336_vm4, %v318_v42, %v322_v43 }
 0x1c8   :  { %v331_v48 = vrot.slane %v329_v45, 1  ;;  %v335_v49 = vrot.slane %v333_v46, 2  ;;  %v339_v50 = vrot.slane %v337_v47, 3  ;;  %360 = vst [vmem:[#allocation10] sm:$0x1] %v327_v44  ;;  %v315_v51 = vpop.f32.mrf.mxu2 }
 0x1c9   :  { %v316_v52 = vadd.f32 %v503_v39, %v315_v51 }
 0x1ca   :  { %361 = vst [vmem:[#allocation10 + $0x1] sm:$0x1] %v331_v48 }
 0x1cb   :  { %362 = vst [vmem:[#allocation10 + $0x2] sm:$0x1] %v335_v49  ;;  %v319_v53 = vpack.c.bf16 %v316_v52, %v316_v52 }
 0x1cc   :  { %363 = vst [vmem:[#allocation10 + $0x3] sm:$0x1] %v339_v50 }
 0x1cd   :  { %v323_v54 = vrot.slane %v319_v53, 3 }
 0x1cf   :  { %v342_v55 = vsel %vm324_vm1, %v319_v53, %v323_v54  ;;  %v343_v56 = vsel %vm328_vm2, %v319_v53, %v323_v54  ;;  %v346_v57 = vsel %vm332_vm3, %v319_v53, %v323_v54  ;;  %v349_v58 = vsel %vm336_vm4, %v319_v53, %v323_v54 }
 0x1d0   :  { %v345_v59 = vrot.slane %v343_v56, 1  ;;  %v348_v60 = vrot.slane %v346_v57, 2  ;;  %v351_v61 = vrot.slane %v349_v58, 3  ;;  %364 = vst [vmem:[#allocation10 + $0x4] sm:$0x1] %v342_v55 }
 0x1d2   :  { %365 = vst [vmem:[#allocation10 + $0x5] sm:$0x1] %v345_v59 }
 0x1d3   :  { %366 = vst [vmem:[#allocation10 + $0x6] sm:$0x1] %v348_v60 }
 0x1d4   :  { %367 = vst [vmem:[#allocation10 + $0x7] sm:$0x1] %v351_v61 }
 0x1d5   :  { %371 = vsyncadd [#allocation4], 112  ;;  %s374_s26 = sshll.u32 %s722_s7, 4  ;;  %s640_s27 = smov [#allocation10]   ;;  %s375_s26 = int_to_ptr.hbm [resolvable:$true] %s374_s26 }
 0x1d6   :  { %s372_s28 = sshll.u32 %s640_s27, 4  ;;  %s641_s29 = smov 16   ;;  %s373_s28 = int_to_ptr.vmem [resolvable:$true] %s372_s28 }
 0x1d7   :  { %s642_s30 = smov 1  }
 0x1d8   :  { %380 = dma.vmem_to_hbm [thread:$0]  %s373_s28, 16, %s375_s26, [#allocation4], %s641_s29, %s641_s29, %s642_s30  }
 0x1d9   :  { %630 = dma.done.wait [#allocation4], 128  }
 0x1da   :  { %631 = vsyncadd [#allocation4], 4294967168 }
 0x1db   :  { %385 = vsyncpa [#allocation3], 1 }
 0x1dc   :  { %386 = vsyncpa [#allocation6], 1 }
 0x1dd   :  { %387 = vsyncpa [#allocation9], 1 }
 0x1de   :  { %388 = vsyncpa [#allocation4], 1 }

</bundles_post_ra>
